<compile_context>
chip_gen: v7x
topology: tpu7x:2x2x1
jax: 0.10.0
libtpu: 0.0.40
codegen_flags: <defaults>
</compile_context>

<pallas_src>
import functools

import jax
import jax.numpy as jnp
from jax.experimental import pallas as pl
from jax.experimental.pallas import tpu as pltpu

_LANE = 128
_SUBLANE = 8


def _wmse_partial_kernel(pred_ref, targ_ref, out_ref, *, rows, tm):
    # pred block: (tm, 128) f32; targ block: (2, tm, 128) f32
    #   targ_ref[0] = target values, targ_ref[1] = weights - 1
    # out block: (1, 128) f32 lane-dense partial sums.
    diff = pred_ref[...] - targ_ref[0]
    contrib = diff * diff * (targ_ref[1] + 1.0)

    if rows % tm != 0:
        # Ragged last block: rows beyond the valid extent hold unspecified
        # data (Pallas pads boundary blocks) -> mask them to zero.
        i = pl.program_id(0)
        row_idx = jax.lax.broadcasted_iota(jnp.int32, (tm, _LANE), 0)
        valid = (i * tm + row_idx) < rows
        contrib = jnp.where(valid, contrib, 0.0)

    # Sublane (XLU) partial reduction -> lane-dense (1, 128) partial sums.
    out_ref[...] = jnp.sum(contrib, axis=0, keepdims=True)


def weighted_mse_loss_pallas(inputs, targets, *, block_rows=2048):
    """Forward of WeightedMSELoss.

    inputs:  predictions, any shape (canonically (B, 1)).
    targets: array (or pair) of shape (2, *inputs.shape):
             targets[0] = target values, targets[1] = weights - 1.
    """
    pred = jnp.asarray(inputs, jnp.float32).reshape(-1)
    targ = jnp.asarray(targets, jnp.float32).reshape(2, -1)
    n = pred.shape[0]
    if n == 0:
        # torch.mean of an empty tensor is NaN.
        return jnp.float32(float("nan"))

    # Lane-dense (rows, 128) view. Only the sub-128 remainder is padded
    # (no-op when n % 128 == 0); padded pred/target are 0 -> zero contribution.
    rows = pl.cdiv(n, _LANE)
    rem = rows * _LANE - n
    if rem:
        pred = jnp.pad(pred, (0, rem))
        targ = jnp.pad(targ, ((0, 0), (0, rem)))
    pred = pred.reshape(rows, _LANE)
    targ = targ.reshape(2, rows, _LANE)

    # Block size: large enough to amortize per-step overhead, small enough for
    # VMEM on every generation, and capped at ~rows/2 (8-aligned) so there are
    # >=2 blocks for v7x's two TensorCores whenever possible.
    half8 = ((pl.cdiv(rows, 2) + _SUBLANE - 1) // _SUBLANE) * _SUBLANE
    tm = max(_SUBLANE, min(block_rows, half8))
    num_blocks = pl.cdiv(rows, tm)

    partials = pl.pallas_call(
        functools.partial(_wmse_partial_kernel, rows=rows, tm=tm),
        out_shape=jax.ShapeDtypeStruct((num_blocks, _LANE), jnp.float32),
        grid=(num_blocks,),
        in_specs=[
            pl.BlockSpec((tm, _LANE), lambda i: (i, 0)),
            pl.BlockSpec((2, tm, _LANE), lambda i: (0, i, 0)),
        ],
        out_specs=pl.BlockSpec((1, _LANE), lambda i: (i, 0)),
        compiler_params=pltpu.CompilerParams(
            dimension_semantics=("parallel",)),
    )(pred, targ)

    # Tiny final reduction + mean via a single multiply (N is static).
    return jnp.sum(partials) * jnp.float32(1.0 / n)


class WeightedMSELoss:
    """JAX/Pallas port of the PyTorch WeightedMSELoss module (forward only)."""

    def __init__(self, **kwargs):
        pass

    def __call__(self, inputs, targets):
        return weighted_mse_loss_pallas(inputs, targets)


def _reference(inputs, targets):
    # Pure-JAX mirror of the PyTorch forward for sanity checking.
    weights = targets[1] + 1.0
    loss = (inputs - targets[0]) ** 2
    loss = loss * weights
    return jnp.mean(loss)


if __name__ == "__main__":
    key = jax.random.PRNGKey(0)
    k1, k2, k3 = jax.random.split(key, 3)
    B = 8
    inputs = jax.random.normal(k1, (B, 1), dtype=jnp.float32)
    targ_vals = jax.random.normal(k2, (B, 1), dtype=jnp.float32)
    weights_m1 = jax.random.uniform(k3, (B, 1), dtype=jnp.float32)  # targets[1]
    targets = jnp.stack([targ_vals, weights_m1], axis=0)            # (2, B, 1)

    loss_mod = WeightedMSELoss()
    loss = loss_mod(inputs, targets)
    jax.block_until_ready(loss)

    ref = _reference(inputs, targets)
    assert jnp.allclose(loss, ref, rtol=1e-5, atol=1e-6), (loss, ref)

    # A second, larger case exercising the ragged-last-block masking path
    # (rows not a multiple of tm, n not a multiple of 128).
    B2 = 5000
    k4, k5, k6 = jax.random.split(jax.random.PRNGKey(1), 3)
    inputs2 = jax.random.normal(k4, (B2, 1), dtype=jnp.float32)
    targets2 = jnp.stack([jax.random.normal(k5, (B2, 1), dtype=jnp.float32),
                          jax.random.uniform(k6, (B2, 1), dtype=jnp.float32)], axis=0)
    loss2 = loss_mod(inputs2, targets2)
    jax.block_until_ready(loss2)
    ref2 = _reference(inputs2, targets2)
    assert jnp.allclose(loss2, ref2, rtol=1e-5, atol=1e-6), (loss2, ref2)

    print("KERNEL_OK")
</pallas_src>

<mosaic_0001>
module attributes {stable_mosaic.version = 11 : i64} {
  func.func @_wmse_partial_kernel(%arg0: i32, %arg1: memref<8x128xf32, #tpu.memory_space<vmem>>, %arg2: memref<2x8x128xf32, #tpu.memory_space<vmem>>, %arg3: memref<1x128xf32, #tpu.memory_space<vmem>>) attributes {dimension_semantics = [#tpu.dimension_semantics<parallel>], iteration_bounds = array<i64: 1>, scalar_prefetch = 0 : i64, scratch_operands = 0 : i64, tpu.core_type = #tpu.core_type<tc>, window_params = [{transform_indices = @transform_0, window_bounds = array<i64: 8, 128>}, {transform_indices = @transform_1, window_bounds = array<i64: 2, 8, 128>}, {transform_indices = @transform_2, window_bounds = array<i64: 1, 128>}]} {
    %c0 = arith.constant 0 : index
    %c0_0 = arith.constant 0 : index
    %0 = vector.load %arg1[%c0, %c0_0] : memref<8x128xf32, #tpu.memory_space<vmem>>, vector<8x128xf32>
    %c0_1 = arith.constant 0 : index
    %c0_2 = arith.constant 0 : index
    %c0_3 = arith.constant 0 : index
    %1 = vector.load %arg2[%c0_1, %c0_2, %c0_3] : memref<2x8x128xf32, #tpu.memory_space<vmem>>, vector<1x8x128xf32>
    %2 = vector.shape_cast %1 : vector<1x8x128xf32> to vector<8x128xf32>
    %3 = arith.subf %0, %2 : vector<8x128xf32>
    %4 = arith.mulf %3, %3 : vector<8x128xf32>
    %c1 = arith.constant 1 : index
    %c0_4 = arith.constant 0 : index
    %c0_5 = arith.constant 0 : index
    %5 = vector.load %arg2[%c1, %c0_4, %c0_5] : memref<2x8x128xf32, #tpu.memory_space<vmem>>, vector<1x8x128xf32>
    %6 = vector.shape_cast %5 : vector<1x8x128xf32> to vector<8x128xf32>
    %cst = arith.constant 1.000000e+00 : f32
    %7 = vector.broadcast %cst : f32 to vector<8x128xf32>
    %8 = arith.addf %6, %7 : vector<8x128xf32>
    %9 = arith.mulf %4, %8 : vector<8x128xf32>
    %10 = tpu.iota {dimensions = array<i32: 0>} : vector<8x128xi32>
    %c8_i32 = arith.constant 8 : i32
    %11 = arith.muli %arg0, %c8_i32 : i32
    %12 = vector.broadcast %11 : i32 to vector<8x128xi32>
    %13 = arith.addi %12, %10 : vector<8x128xi32>
    %c1_i32 = arith.constant 1 : i32
    %14 = vector.broadcast %c1_i32 : i32 to vector<8x128xi32>
    %15 = arith.cmpi slt, %13, %14 : vector<8x128xi32>
    %cst_6 = arith.constant 0.000000e+00 : f32
    %16 = vector.broadcast %cst_6 : f32 to vector<8x128xf32>
    %17 = arith.select %15, %9, %16 : vector<8x128xi1>, vector<8x128xf32>
    %cst_7 = arith.constant dense<0.000000e+00> : vector<128xf32>
    %18 = vector.multi_reduction <add>, %17, %cst_7 [0] : vector<8x128xf32> to vector<128xf32>
    %19 = vector.shape_cast %18 : vector<128xf32> to vector<1x128xf32>
    %c0_8 = arith.constant 0 : index
    %c0_9 = arith.constant 0 : index
    %20 = vector.load %arg3[%c0_8, %c0_9] : memref<1x128xf32, #tpu.memory_space<vmem>>, vector<1x128xf32>
    tpu.vector_store %arg3[%c0_8, %c0_9], %19 {strides = array<i32>} : memref<1x128xf32, #tpu.memory_space<vmem>>, vector<1x128xf32>,
    return
  }
  func.func @transform_0(%arg0: i32) -> (i32, i32) {
    %c0_i32 = arith.constant 0 : i32
    %c0_i32_0 = arith.constant 0 : i32
    return %arg0, %c0_i32 : i32, i32
  }
  func.func @transform_1(%arg0: i32) -> (i32, i32, i32) {
    %c0_i32 = arith.constant 0 : i32
    %c0_i32_0 = arith.constant 0 : i32
    %c0_i32_1 = arith.constant 0 : i32
    return %c0_i32, %arg0, %c0_i32_0 : i32, i32, i32
  }
  func.func @transform_2(%arg0: i32) -> (i32, i32) {
    %c0_i32 = arith.constant 0 : i32
    %c0_i32_0 = arith.constant 0 : i32
    return %arg0, %c0_i32 : i32, i32
  }
}

</mosaic_0001>

<bundles_post_ra>
// kernel: tpu_custom_call.1
= control target key start
LH: loop header
LB: loop body
LE: loop exit
PB: predicated region body
PF: predicated region fallthrough
CT: control target
= control target key end

     0   :  { %7 = vsyncpa [#allocation3], 0  ;;  %s205_s0 = inlined_call_operand.hbm [shape: f32[1,128], index: 0, kind: input, shape index: {}]   ;;  %s206_s1 = inlined_call_operand.vmem [shape: f32[2,1,128], index: 1, kind: input, shape index: {}]   ;;  %s207_s2 = inlined_call_operand.hbm [shape: f32[1,128], index: 2, kind: output, shape index: {}]  }
   0x1   :  { %8 = vsyncpa [#allocation4], 0 }
   0x2   :  { %13 = vsyncadd [#allocation3], 112  ;;  %v38_v0 = vld [vmem:[%s206_s1] sm:$0x1]  ;;  %s156_s11 = smov [#allocation2]   ;;  %s108_s17 = scalar_lea.hbm %s205_s0, 16 }
   0x3   :  { %s14_s12 = sshll.u32 %s156_s11, 4  ;;  %39 = vst [vmem:[#allocation5] sm:$0x1] %v38_v0  ;;  %v40_v1 = vld [vmem:[%s206_s1 + $0x1] sm:$0x1]  ;;  %p109_p0 = scmp.ne.s32.totalorder %s205_s0, %s108_s17  ;;  %s15_s12 = int_to_ptr.vmem [resolvable:$true] %s14_s12 }
   0x4   :  { %41 = vst [vmem:[#allocation5 + $0x8] sm:$0x1] %v40_v1  ;;  %p112_p1 = scmp.lt.u32.totalorder %s108_s17, %s205_s0 }
   0x6   :  { %p114_p2 = pnand %p112_p1, %p109_p0 }
   0x8   :  { %117 = shalt.err (!%p114_p2)
}
   0x9   :  { %s118_s22 = scalar_lea.vmem %s15_s12, 16  ;;  %s122_s23 = scalar_lea.vmem %s15_s12, 128 }
   0xa   :  { %p119_p3 = scmp.ne.s32.totalorder %s15_s12, %s118_s22  ;;  %p123_p4 = scmp.lt.s32.totalorder %s15_s12, %s15_s12 }
   0xb   :  { %p124_p5 = scmp.lt.s32.totalorder %s122_s23, %s118_s22 }
   0xd   :  { %p125_p6 = por %p124_p5, %p123_p4 }
   0xf   :  { %p126_p7 = pnand %p125_p6, %p119_p3 }
  0x11   :  { %129 = shalt.err (!%p126_p7)
}
  0x12   :  { %s157_s1 = smov 16   ;;  %s158_s24 = smov 1  }
  0x13   :  { %20 = dma.hbm_to_vmem [thread:$0]  %s205_s0, 16, %s15_s12, [#allocation3], %s157_s1, %s157_s1, %s158_s24  }
  0x14   :  { %152 = dma.done.wait [#allocation3], 128  }
  0x15   :  { %153 = vsyncadd [#allocation3], 4294967168  ;;  %v71_v2 = vlaneseq  ;;  %v63_v3 = vld [vmem:[#allocation2] sm:$0xff]  ;;  %v64_v4 = vld [vmem:[#allocation5] sm:$0xff]  ;;  %s159_s27 = smov [#allocation6]  }
  0x16   :  { %v68_v5 = vld [vmem:[#allocation5 + $0x8] sm:$0xff]  ;;  %v65_v7 = vsub.f32 %v63_v3, %v64_v4  ;;  %s91_s28 = sshll.u32 %s159_s27, 4  ;;  %s92_s28 = int_to_ptr.vmem [resolvable:$true] %s91_s28 }
  0x17   :  { %v72_v6 = vshrl.u32 %v71_v2, 7  ;;  %v69_v8 = vadd.f32 1.0, %v68_v5  ;;  %s130_s0 = scalar_lea.vmem %s92_s28, 16  ;;  %s134_s29 = scalar_lea.vmem %s92_s28, 32 }
  0x18   :  { %v66_v9 = vmul.f32 %v65_v7, %v65_v7  ;;  %p131_p8 = scmp.ne.s32.totalorder %s92_s28, %s130_s0  ;;  %p135_p9 = scmp.lt.s32.totalorder %s92_s28, %s92_s28 }
  0x19   :  { %vm76_vm0 = vcmp.lt.s32.totalorder %v72_v6, 1  ;;  %p136_p10 = scmp.lt.s32.totalorder %s134_s29, %s130_s0 }
  0x1a   :  { %v70_v10 = vmul.f32 %v69_v8, %v66_v9 }
  0x1b   :  { %p137_p11 = por %p136_p10, %p135_p9 }
  0x1c   :  { %v77_v11 = vsel %vm76_vm0, %v70_v10, 0.0 }
  0x1d   :  { %v78_v12 = vrot.slane %v77_v11, 4  ;;  %p138_p12 = pnand %p137_p11, %p131_p8 }
  0x1f   :  { %v79_v13 = vadd.f32 %v78_v12, %v77_v11 }
  0x21   :  { %v80_v14 = vrot.slane %v79_v13, 2 }
  0x23   :  { %v81_v15 = vadd.f32 %v80_v14, %v79_v13 }
  0x25   :  { %v82_v16 = vrot.slane %v81_v15, 1 }
  0x27   :  { %v83_v17 = vadd.f32 %v82_v16, %v81_v15 }
  0x29   :  { %84 = vst [vmem:[#allocation6] sm:$0x1] %v83_v17 }
  0x2a   :  { %141 = shalt.err (!%p138_p12)
}
  0x2b   :  { %s142_s4 = scalar_lea.hbm %s207_s2, 16 }
  0x2c   :  { %p143_p13 = scmp.ne.s32.totalorder %s207_s2, %s142_s4  ;;  %p146_p0 = scmp.lt.u32.totalorder %s142_s4, %s207_s2 }
  0x2e   :  { %p148_p1 = pnand %p146_p0, %p143_p13 }
  0x30   :  { %151 = shalt.err (!%p148_p1)
}
  0x31   :  { %94 = dma.vmem_to_hbm [thread:$0]  %s92_s28, 16, %s207_s2, [#allocation4]  }
  0x32   :  { %154 = dma.done.wait [#allocation4], 16  }
  0x33   :  { %155 = vsyncadd [#allocation4], 4294967280 }
  0x34   :  { %98 = vsyncpa [#allocation3], 1 }
  0x35   :  { %99 = vsyncpa [#allocation4], 1 }

</bundles_post_ra>
